<compile_context>
chip_gen: v7x
topology: tpu7x:2x2x1
jax: 0.10.0
libtpu: 0.0.40
codegen_flags: <defaults>
</compile_context>

<pallas_src>
import jax
import jax.numpy as jnp
from jax.experimental import pallas as pl
from jax.experimental.pallas import tpu as pltpu


def _decoder_kernel(state_ref, wb_ref, fc_ref, out_ref):
    """Single invocation: all T decoder steps run as straight-line code."""
    B = state_ref.shape[0] // 2
    H = state_ref.shape[1]
    I = fc_ref.shape[1]
    T = out_ref.shape[1] // I

    # --- loop-invariant loads (all sublane-aligned static slices) -----------
    h = state_ref[0:B, :]                       # (B, H)  h0
    c = state_ref[B:2 * B, :]                   # (B, H)  c0

    w_step0 = wb_ref[0:H, :]                    # (H, 4H) W_hh^T          (t = 0, x_0 = 0)
    w_fold = wb_ref[H:2 * H, :]                 # (H, 4H) W_hh^T + W_fc^T@W_ih^T   (t >= 1)
    b_step0 = wb_ref[2 * H:2 * H + B, :]        # (B, 4H) b_ih + b_hh              (broadcast)
    b_fold = wb_ref[2 * H + B:2 * H + 2 * B, :]  # (B, 4H) b + b_fc@W_ih^T         (broadcast)

    wfc = fc_ref[0:H, :]                        # (H, I)  W_fc^T
    bfc = fc_ref[H:H + B, :]                    # (B, I)  b_fc (broadcast)

    # --- T serial recurrence steps, fully unrolled ---------------------------
    for t in range(T):                          # static Python unroll
        if t == 0:
            gates = jnp.dot(h, w_step0, preferred_element_type=jnp.float32) + b_step0
        else:
            # fc projection folded into the recurrent weight: one matmul/step.
            gates = jnp.dot(h, w_fold, preferred_element_type=jnp.float32) + b_fold

        # Two full-vreg EUP pushes; PyTorch gate order (i, f, g, o).
        sig = jax.nn.sigmoid(gates)
        th = jnp.tanh(gates)
        i_g = sig[:, 0 * H:1 * H]
        f_g = sig[:, 1 * H:2 * H]
        g_g = th[:, 2 * H:3 * H]
        o_g = sig[:, 3 * H:4 * H]

        c = f_g * c + i_g * g_g
        h = o_g * jnp.tanh(c)

        # Output projection is OFF the recurrence path now: small matmul +
        # static lane-slice store into the lane-dense (B, T*I) slab.
        y = jnp.dot(h, wfc, preferred_element_type=jnp.float32) + bfc
        out_ref[:, t * I:(t + 1) * I] = y


def rnn_decoder(h, c, seq_length, params):
    """h, c: (1, B, H) float32 (num_layers=1). Returns (B, seq_length, input_dim)."""
    wih_t, whh_t, b, wfc_t, bfc = params        # (I,4H), (H,4H), (4H,), (H,I), (I,)
    B, H = h.shape[1], h.shape[2]
    I = wfc_t.shape[1]

    h0, c0 = h[0], c[0]

    # Fold the fc projection into the recurrence (valid for steps t >= 1):
    #   gates_t = x_t@Wih^T + h@Whh^T + b,  x_t = h@Wfc^T + b_fc
    #           = h@(Whh^T + Wfc^T@Wih^T) + (b + b_fc@Wih^T)
    w_fold = whh_t + wfc_t @ wih_t                                  # (H, 4H)
    b_fold = b + bfc @ wih_t                                        # (4H,)

    b0_bcast = jnp.broadcast_to(b.reshape(1, 4 * H), (B, 4 * H))
    bf_bcast = jnp.broadcast_to(b_fold.reshape(1, 4 * H), (B, 4 * H))
    bfc_bcast = jnp.broadcast_to(bfc.reshape(1, I), (B, I))

    # Pack 6 tiny inputs into 3 sublane-aligned slabs (3 DMAs instead of 6).
    state_slab = jnp.concatenate([h0, c0], axis=0)                  # (2B, H)
    wb_slab = jnp.concatenate([whh_t, w_fold, b0_bcast, bf_bcast], axis=0)  # (2H+2B, 4H)
    fc_slab = jnp.concatenate([wfc_t, bfc_bcast], axis=0)           # (H+B, I)

    vmem = pl.BlockSpec(memory_space=pltpu.MemorySpace.VMEM)

    out = pl.pallas_call(
        _decoder_kernel,
        out_shape=jax.ShapeDtypeStruct((B, seq_length * I), jnp.float32),
        in_specs=[vmem, vmem, vmem],
        out_specs=vmem,
    )(state_slab, wb_slab, fc_slab)

    # (B, T*I) lane-dense slab -> batch-first (B, T, I), same order as
    # torch.cat(outputs, dim=1).
    return out.reshape(B, seq_length, I)


def _reference(h, c, seq_length, params):
    """Pure-JAX reference mirroring the PyTorch forward (un-folded math)."""
    wih_t, whh_t, b, wfc_t, bfc = params
    B, H = h.shape[1], h.shape[2]
    I = wfc_t.shape[1]
    h_t, c_t = h[0], c[0]
    x = jnp.zeros((B, I), jnp.float32)
    outs = []
    for _ in range(seq_length):
        gates = x @ wih_t + h_t @ whh_t + b
        i_g = jax.nn.sigmoid(gates[:, 0 * H:1 * H])
        f_g = jax.nn.sigmoid(gates[:, 1 * H:2 * H])
        g_g = jnp.tanh(gates[:, 2 * H:3 * H])
        o_g = jax.nn.sigmoid(gates[:, 3 * H:4 * H])
        c_t = f_g * c_t + i_g * g_g
        h_t = o_g * jnp.tanh(c_t)
        x = h_t @ wfc_t + bfc
        outs.append(x)
    return jnp.stack(outs, axis=1)


if __name__ == "__main__":
    # Small shapes consistent with the module: input_dim=16, hidden_dim=32,
    # num_layers=1, batch=8, seq_length=8 (T*I = 128 -> lane-dense output).
    INPUT_DIM, HIDDEN_DIM, BATCH, SEQ = 16, 32, 8, 8

    key = jax.random.PRNGKey(0)
    ks = jax.random.split(key, 8)
    scale = 0.1
    # Deterministic synthetic parameters (PyTorch LSTM gate order i, f, g, o).
    w_ih = scale * jax.random.normal(ks[0], (4 * HIDDEN_DIM, INPUT_DIM), jnp.float32)
    w_hh = scale * jax.random.normal(ks[1], (4 * HIDDEN_DIM, HIDDEN_DIM), jnp.float32)
    b_ih = scale * jax.random.normal(ks[2], (4 * HIDDEN_DIM,), jnp.float32)
    b_hh = scale * jax.random.normal(ks[3], (4 * HIDDEN_DIM,), jnp.float32)
    w_fc = scale * jax.random.normal(ks[4], (INPUT_DIM, HIDDEN_DIM), jnp.float32)
    b_fc = scale * jax.random.normal(ks[5], (INPUT_DIM,), jnp.float32)

    params = (w_ih.T, w_hh.T, b_ih + b_hh, w_fc.T, b_fc)

    h0 = jax.random.normal(ks[6], (1, BATCH, HIDDEN_DIM), jnp.float32)
    c0 = jax.random.normal(ks[7], (1, BATCH, HIDDEN_DIM), jnp.float32)

    out = rnn_decoder(h0, c0, SEQ, params)
    out = jax.block_until_ready(out)

    ref = _reference(h0, c0, SEQ, params)
    assert out.shape == (BATCH, SEQ, INPUT_DIM)
    # Slightly looser tolerance: folding W_fc into the recurrent weight changes
    # the fp32 accumulation order vs. the PyTorch-order reference.
    assert jnp.allclose(out, ref, atol=1e-4, rtol=1e-4)

    print("KERNEL_OK")
</pallas_src>

<mosaic_0001>
module attributes {stable_mosaic.version = 11 : i64} {
  func.func @_decoder_kernel(%arg0: memref<16x32xf32, #tpu.memory_space<vmem>>, %arg1: memref<80x128xf32, #tpu.memory_space<vmem>>, %arg2: memref<40x16xf32, #tpu.memory_space<vmem>>, %arg3: memref<8x128xf32, #tpu.memory_space<vmem>>) attributes {dimension_semantics = [], scalar_prefetch = 0 : i64, scratch_operands = 0 : i64, tpu.core_type = #tpu.core_type<tc>} {
    %c0 = arith.constant 0 : index
    %c0_0 = arith.constant 0 : index
    %0 = vector.load %arg0[%c0, %c0_0] : memref<16x32xf32, #tpu.memory_space<vmem>>, vector<8x32xf32>
    %c8 = arith.constant 8 : index
    %c0_1 = arith.constant 0 : index
    %1 = vector.load %arg0[%c8, %c0_1] : memref<16x32xf32, #tpu.memory_space<vmem>>, vector<8x32xf32>
    %c0_2 = arith.constant 0 : index
    %c0_3 = arith.constant 0 : index
    %2 = vector.load %arg1[%c0_2, %c0_3] : memref<80x128xf32, #tpu.memory_space<vmem>>, vector<32x128xf32>
    %c32 = arith.constant 32 : index
    %c0_4 = arith.constant 0 : index
    %3 = vector.load %arg1[%c32, %c0_4] : memref<80x128xf32, #tpu.memory_space<vmem>>, vector<32x128xf32>
    %c64 = arith.constant 64 : index
    %c0_5 = arith.constant 0 : index
    %4 = vector.load %arg1[%c64, %c0_5] : memref<80x128xf32, #tpu.memory_space<vmem>>, vector<8x128xf32>
    %c72 = arith.constant 72 : index
    %c0_6 = arith.constant 0 : index
    %5 = vector.load %arg1[%c72, %c0_6] : memref<80x128xf32, #tpu.memory_space<vmem>>, vector<8x128xf32>
    %c0_7 = arith.constant 0 : index
    %c0_8 = arith.constant 0 : index
    %6 = vector.load %arg2[%c0_7, %c0_8] : memref<40x16xf32, #tpu.memory_space<vmem>>, vector<32x16xf32>
    %c32_9 = arith.constant 32 : index
    %c0_10 = arith.constant 0 : index
    %7 = vector.load %arg2[%c32_9, %c0_10] : memref<40x16xf32, #tpu.memory_space<vmem>>, vector<8x16xf32>
    %cst = arith.constant dense<0.000000e+00> : vector<8x128xf32>
    %8 = tpu.matmul %0, %2, %cst {dimension_numbers = #tpu.dot_dimension_numbers<[1], [0], [0], [1], [0, 0, 1, 1], [], []>} : vector<8x32xf32>, vector<32x128xf32>, vector<8x128xf32> -> vector<8x128xf32>
    %9 = arith.addf %8, %4 : vector<8x128xf32>
    %10 = arith.negf %9 : vector<8x128xf32>
    %11 = math.exp %10 : vector<8x128xf32>
    %cst_11 = arith.constant 1.000000e+00 : f32
    %12 = vector.broadcast %cst_11 : f32 to vector<8x128xf32>
    %13 = arith.addf %12, %11 : vector<8x128xf32>
    %14 = arith.divf %12, %13 : vector<8x128xf32>
    %15 = math.tanh %9 : vector<8x128xf32>
    %16 = vector.extract_strided_slice %14 {offsets = [0, 0], sizes = [8, 32], strides = [1, 1]} : vector<8x128xf32> to vector<8x32xf32>
    %17 = vector.extract_strided_slice %14 {offsets = [0, 32], sizes = [8, 32], strides = [1, 1]} : vector<8x128xf32> to vector<8x32xf32>
    %18 = vector.extract_strided_slice %15 {offsets = [0, 64], sizes = [8, 32], strides = [1, 1]} : vector<8x128xf32> to vector<8x32xf32>
    %19 = vector.extract_strided_slice %14 {offsets = [0, 96], sizes = [8, 32], strides = [1, 1]} : vector<8x128xf32> to vector<8x32xf32>
    %20 = arith.mulf %17, %1 : vector<8x32xf32>
    %21 = arith.mulf %16, %18 : vector<8x32xf32>
    %22 = arith.addf %20, %21 : vector<8x32xf32>
    %23 = math.tanh %22 : vector<8x32xf32>
    %24 = arith.mulf %19, %23 : vector<8x32xf32>
    %cst_12 = arith.constant dense<0.000000e+00> : vector<8x16xf32>
    %25 = tpu.matmul %24, %6, %cst_12 {dimension_numbers = #tpu.dot_dimension_numbers<[1], [0], [0], [1], [0, 0, 1, 1], [], []>} : vector<8x32xf32>, vector<32x16xf32>, vector<8x16xf32> -> vector<8x16xf32>
    %26 = arith.addf %25, %7 : vector<8x16xf32>
    %c0_13 = arith.constant 0 : index
    %c0_14 = arith.constant 0 : index
    %27 = vector.load %arg3[%c0_13, %c0_14] : memref<8x128xf32, #tpu.memory_space<vmem>>, vector<8x16xf32>
    tpu.vector_store %arg3[%c0_13, %c0_14], %26 {strides = array<i32>} : memref<8x128xf32, #tpu.memory_space<vmem>>, vector<8x16xf32>,
    %cst_15 = arith.constant dense<0.000000e+00> : vector<8x128xf32>
    %28 = tpu.matmul %24, %3, %cst_15 {dimension_numbers = #tpu.dot_dimension_numbers<[1], [0], [0], [1], [0, 0, 1, 1], [], []>} : vector<8x32xf32>, vector<32x128xf32>, vector<8x128xf32> -> vector<8x128xf32>
    %29 = arith.addf %28, %5 : vector<8x128xf32>
    %30 = arith.negf %29 : vector<8x128xf32>
    %31 = math.exp %30 : vector<8x128xf32>
    %cst_16 = arith.constant 1.000000e+00 : f32
    %32 = vector.broadcast %cst_16 : f32 to vector<8x128xf32>
    %33 = arith.addf %32, %31 : vector<8x128xf32>
    %34 = arith.divf %32, %33 : vector<8x128xf32>
    %35 = math.tanh %29 : vector<8x128xf32>
    %36 = vector.extract_strided_slice %34 {offsets = [0, 0], sizes = [8, 32], strides = [1, 1]} : vector<8x128xf32> to vector<8x32xf32>
    %37 = vector.extract_strided_slice %34 {offsets = [0, 32], sizes = [8, 32], strides = [1, 1]} : vector<8x128xf32> to vector<8x32xf32>
    %38 = vector.extract_strided_slice %35 {offsets = [0, 64], sizes = [8, 32], strides = [1, 1]} : vector<8x128xf32> to vector<8x32xf32>
    %39 = vector.extract_strided_slice %34 {offsets = [0, 96], sizes = [8, 32], strides = [1, 1]} : vector<8x128xf32> to vector<8x32xf32>
    %40 = arith.mulf %37, %22 : vector<8x32xf32>
    %41 = arith.mulf %36, %38 : vector<8x32xf32>
    %42 = arith.addf %40, %41 : vector<8x32xf32>
    %43 = math.tanh %42 : vector<8x32xf32>
    %44 = arith.mulf %39, %43 : vector<8x32xf32>
    %cst_17 = arith.constant dense<0.000000e+00> : vector<8x16xf32>
    %45 = tpu.matmul %44, %6, %cst_17 {dimension_numbers = #tpu.dot_dimension_numbers<[1], [0], [0], [1], [0, 0, 1, 1], [], []>} : vector<8x32xf32>, vector<32x16xf32>, vector<8x16xf32> -> vector<8x16xf32>
    %46 = arith.addf %45, %7 : vector<8x16xf32>
    %c0_18 = arith.constant 0 : index
    %c16 = arith.constant 16 : index
    %47 = vector.load %arg3[%c0_18, %c16] : memref<8x128xf32, #tpu.memory_space<vmem>>, vector<8x16xf32>
    tpu.vector_store %arg3[%c0_18, %c16], %46 {strides = array<i32>} : memref<8x128xf32, #tpu.memory_space<vmem>>, vector<8x16xf32>,
    %cst_19 = arith.constant dense<0.000000e+00> : vector<8x128xf32>
    %48 = tpu.matmul %44, %3, %cst_19 {dimension_numbers = #tpu.dot_dimension_numbers<[1], [0], [0], [1], [0, 0, 1, 1], [], []>} : vector<8x32xf32>, vector<32x128xf32>, vector<8x128xf32> -> vector<8x128xf32>
    %49 = arith.addf %48, %5 : vector<8x128xf32>
    %50 = arith.negf %49 : vector<8x128xf32>
    %51 = math.exp %50 : vector<8x128xf32>
    %cst_20 = arith.constant 1.000000e+00 : f32
    %52 = vector.broadcast %cst_20 : f32 to vector<8x128xf32>
    %53 = arith.addf %52, %51 : vector<8x128xf32>
    %54 = arith.divf %52, %53 : vector<8x128xf32>
    %55 = math.tanh %49 : vector<8x128xf32>
    %56 = vector.extract_strided_slice %54 {offsets = [0, 0], sizes = [8, 32], strides = [1, 1]} : vector<8x128xf32> to vector<8x32xf32>
    %57 = vector.extract_strided_slice %54 {offsets = [0, 32], sizes = [8, 32], strides = [1, 1]} : vector<8x128xf32> to vector<8x32xf32>
    %58 = vector.extract_strided_slice %55 {offsets = [0, 64], sizes = [8, 32], strides = [1, 1]} : vector<8x128xf32> to vector<8x32xf32>
    %59 = vector.extract_strided_slice %54 {offsets = [0, 96], sizes = [8, 32], strides = [1, 1]} : vector<8x128xf32> to vector<8x32xf32>
    %60 = arith.mulf %57, %42 : vector<8x32xf32>
    %61 = arith.mulf %56, %58 : vector<8x32xf32>
    %62 = arith.addf %60, %61 : vector<8x32xf32>
    %63 = math.tanh %62 : vector<8x32xf32>
    %64 = arith.mulf %59, %63 : vector<8x32xf32>
    %cst_21 = arith.constant dense<0.000000e+00> : vector<8x16xf32>
    %65 = tpu.matmul %64, %6, %cst_21 {dimension_numbers = #tpu.dot_dimension_numbers<[1], [0], [0], [1], [0, 0, 1, 1], [], []>} : vector<8x32xf32>, vector<32x16xf32>, vector<8x16xf32> -> vector<8x16xf32>
    %66 = arith.addf %65, %7 : vector<8x16xf32>
    %c0_22 = arith.constant 0 : index
    %c32_23 = arith.constant 32 : index
    %67 = vector.load %arg3[%c0_22, %c32_23] : memref<8x128xf32, #tpu.memory_space<vmem>>, vector<8x16xf32>
    tpu.vector_store %arg3[%c0_22, %c32_23], %66 {strides = array<i32>} : memref<8x128xf32, #tpu.memory_space<vmem>>, vector<8x16xf32>,
    %cst_24 = arith.constant dense<0.000000e+00> : vector<8x128xf32>
    %68 = tpu.matmul %64, %3, %cst_24 {dimension_numbers = #tpu.dot_dimension_numbers<[1], [0], [0], [1], [0, 0, 1, 1], [], []>} : vector<8x32xf32>, vector<32x128xf32>, vector<8x128xf32> -> vector<8x128xf32>
    %69 = arith.addf %68, %5 : vector<8x128xf32>
    %70 = arith.negf %69 : vector<8x128xf32>
    %71 = math.exp %70 : vector<8x128xf32>
    %cst_25 = arith.constant 1.000000e+00 : f32
    %72 = vector.broadcast %cst_25 : f32 to vector<8x128xf32>
    %73 = arith.addf %72, %71 : vector<8x128xf32>
    %74 = arith.divf %72, %73 : vector<8x128xf32>
    %75 = math.tanh %69 : vector<8x128xf32>
    %76 = vector.extract_strided_slice %74 {offsets = [0, 0], sizes = [8, 32], strides = [1, 1]} : vector<8x128xf32> to vector<8x32xf32>
    %77 = vector.extract_strided_slice %74 {offsets = [0, 32], sizes = [8, 32], strides = [1, 1]} : vector<8x128xf32> to vector<8x32xf32>
    %78 = vector.extract_strided_slice %75 {offsets = [0, 64], sizes = [8, 32], strides = [1, 1]} : vector<8x128xf32> to vector<8x32xf32>
    %79 = vector.extract_strided_slice %74 {offsets = [0, 96], sizes = [8, 32], strides = [1, 1]} : vector<8x128xf32> to vector<8x32xf32>
    %80 = arith.mulf %77, %62 : vector<8x32xf32>
    %81 = arith.mulf %76, %78 : vector<8x32xf32>
    %82 = arith.addf %80, %81 : vector<8x32xf32>
    %83 = math.tanh %82 : vector<8x32xf32>
    %84 = arith.mulf %79, %83 : vector<8x32xf32>
    %cst_26 = arith.constant dense<0.000000e+00> : vector<8x16xf32>
    %85 = tpu.matmul %84, %6, %cst_26 {dimension_numbers = #tpu.dot_dimension_numbers<[1], [0], [0], [1], [0, 0, 1, 1], [], []>} : vector<8x32xf32>, vector<32x16xf32>, vector<8x16xf32> -> vector<8x16xf32>
    %86 = arith.addf %85, %7 : vector<8x16xf32>
    %c0_27 = arith.constant 0 : index
    %c48 = arith.constant 48 : index
    %87 = vector.load %arg3[%c0_27, %c48] : memref<8x128xf32, #tpu.memory_space<vmem>>, vector<8x16xf32>
    tpu.vector_store %arg3[%c0_27, %c48], %86 {strides = array<i32>} : memref<8x128xf32, #tpu.memory_space<vmem>>, vector<8x16xf32>,
    %cst_28 = arith.constant dense<0.000000e+00> : vector<8x128xf32>
    %88 = tpu.matmul %84, %3, %cst_28 {dimension_numbers = #tpu.dot_dimension_numbers<[1], [0], [0], [1], [0, 0, 1, 1], [], []>} : vector<8x32xf32>, vector<32x128xf32>, vector<8x128xf32> -> vector<8x128xf32>
    %89 = arith.addf %88, %5 : vector<8x128xf32>
    %90 = arith.negf %89 : vector<8x128xf32>
    %91 = math.exp %90 : vector<8x128xf32>
    %cst_29 = arith.constant 1.000000e+00 : f32
    %92 = vector.broadcast %cst_29 : f32 to vector<8x128xf32>
    %93 = arith.addf %92, %91 : vector<8x128xf32>
    %94 = arith.divf %92, %93 : vector<8x128xf32>
    %95 = math.tanh %89 : vector<8x128xf32>
    %96 = vector.extract_strided_slice %94 {offsets = [0, 0], sizes = [8, 32], strides = [1, 1]} : vector<8x128xf32> to vector<8x32xf32>
    %97 = vector.extract_strided_slice %94 {offsets = [0, 32], sizes = [8, 32], strides = [1, 1]} : vector<8x128xf32> to vector<8x32xf32>
    %98 = vector.extract_strided_slice %95 {offsets = [0, 64], sizes = [8, 32], strides = [1, 1]} : vector<8x128xf32> to vector<8x32xf32>
    %99 = vector.extract_strided_slice %94 {offsets = [0, 96], sizes = [8, 32], strides = [1, 1]} : vector<8x128xf32> to vector<8x32xf32>
    %100 = arith.mulf %97, %82 : vector<8x32xf32>
    %101 = arith.mulf %96, %98 : vector<8x32xf32>
    %102 = arith.addf %100, %101 : vector<8x32xf32>
    %103 = math.tanh %102 : vector<8x32xf32>
    %104 = arith.mulf %99, %103 : vector<8x32xf32>
    %cst_30 = arith.constant dense<0.000000e+00> : vector<8x16xf32>
    %105 = tpu.matmul %104, %6, %cst_30 {dimension_numbers = #tpu.dot_dimension_numbers<[1], [0], [0], [1], [0, 0, 1, 1], [], []>} : vector<8x32xf32>, vector<32x16xf32>, vector<8x16xf32> -> vector<8x16xf32>
    %106 = arith.addf %105, %7 : vector<8x16xf32>
    %c0_31 = arith.constant 0 : index
    %c64_32 = arith.constant 64 : index
    %107 = vector.load %arg3[%c0_31, %c64_32] : memref<8x128xf32, #tpu.memory_space<vmem>>, vector<8x16xf32>
    tpu.vector_store %arg3[%c0_31, %c64_32], %106 {strides = array<i32>} : memref<8x128xf32, #tpu.memory_space<vmem>>, vector<8x16xf32>,
    %cst_33 = arith.constant dense<0.000000e+00> : vector<8x128xf32>
    %108 = tpu.matmul %104, %3, %cst_33 {dimension_numbers = #tpu.dot_dimension_numbers<[1], [0], [0], [1], [0, 0, 1, 1], [], []>} : vector<8x32xf32>, vector<32x128xf32>, vector<8x128xf32> -> vector<8x128xf32>
    %109 = arith.addf %108, %5 : vector<8x128xf32>
    %110 = arith.negf %109 : vector<8x128xf32>
    %111 = math.exp %110 : vector<8x128xf32>
    %cst_34 = arith.constant 1.000000e+00 : f32
    %112 = vector.broadcast %cst_34 : f32 to vector<8x128xf32>
    %113 = arith.addf %112, %111 : vector<8x128xf32>
    %114 = arith.divf %112, %113 : vector<8x128xf32>
    %115 = math.tanh %109 : vector<8x128xf32>
    %116 = vector.extract_strided_slice %114 {offsets = [0, 0], sizes = [8, 32], strides = [1, 1]} : vector<8x128xf32> to vector<8x32xf32>
    %117 = vector.extract_strided_slice %114 {offsets = [0, 32], sizes = [8, 32], strides = [1, 1]} : vector<8x128xf32> to vector<8x32xf32>
    %118 = vector.extract_strided_slice %115 {offsets = [0, 64], sizes = [8, 32], strides = [1, 1]} : vector<8x128xf32> to vector<8x32xf32>
    %119 = vector.extract_strided_slice %114 {offsets = [0, 96], sizes = [8, 32], strides = [1, 1]} : vector<8x128xf32> to vector<8x32xf32>
    %120 = arith.mulf %117, %102 : vector<8x32xf32>
    %121 = arith.mulf %116, %118 : vector<8x32xf32>
    %122 = arith.addf %120, %121 : vector<8x32xf32>
    %123 = math.tanh %122 : vector<8x32xf32>
    %124 = arith.mulf %119, %123 : vector<8x32xf32>
    %cst_35 = arith.constant dense<0.000000e+00> : vector<8x16xf32>
    %125 = tpu.matmul %124, %6, %cst_35 {dimension_numbers = #tpu.dot_dimension_numbers<[1], [0], [0], [1], [0, 0, 1, 1], [], []>} : vector<8x32xf32>, vector<32x16xf32>, vector<8x16xf32> -> vector<8x16xf32>
    %126 = arith.addf %125, %7 : vector<8x16xf32>
    %c0_36 = arith.constant 0 : index
    %c80 = arith.constant 80 : index
    %127 = vector.load %arg3[%c0_36, %c80] : memref<8x128xf32, #tpu.memory_space<vmem>>, vector<8x16xf32>
    tpu.vector_store %arg3[%c0_36, %c80], %126 {strides = array<i32>} : memref<8x128xf32, #tpu.memory_space<vmem>>, vector<8x16xf32>,
    %cst_37 = arith.constant dense<0.000000e+00> : vector<8x128xf32>
    %128 = tpu.matmul %124, %3, %cst_37 {dimension_numbers = #tpu.dot_dimension_numbers<[1], [0], [0], [1], [0, 0, 1, 1], [], []>} : vector<8x32xf32>, vector<32x128xf32>, vector<8x128xf32> -> vector<8x128xf32>
    %129 = arith.addf %128, %5 : vector<8x128xf32>
    %130 = arith.negf %129 : vector<8x128xf32>
    %131 = math.exp %130 : vector<8x128xf32>
    %cst_38 = arith.constant 1.000000e+00 : f32
    %132 = vector.broadcast %cst_38 : f32 to vector<8x128xf32>
    %133 = arith.addf %132, %131 : vector<8x128xf32>
    %134 = arith.divf %132, %133 : vector<8x128xf32>
    %135 = math.tanh %129 : vector<8x128xf32>
    %136 = vector.extract_strided_slice %134 {offsets = [0, 0], sizes = [8, 32], strides = [1, 1]} : vector<8x128xf32> to vector<8x32xf32>
    %137 = vector.extract_strided_slice %134 {offsets = [0, 32], sizes = [8, 32], strides = [1, 1]} : vector<8x128xf32> to vector<8x32xf32>
    %138 = vector.extract_strided_slice %135 {offsets = [0, 64], sizes = [8, 32], strides = [1, 1]} : vector<8x128xf32> to vector<8x32xf32>
    %139 = vector.extract_strided_slice %134 {offsets = [0, 96], sizes = [8, 32], strides = [1, 1]} : vector<8x128xf32> to vector<8x32xf32>
    %140 = arith.mulf %137, %122 : vector<8x32xf32>
    %141 = arith.mulf %136, %138 : vector<8x32xf32>
    %142 = arith.addf %140, %141 : vector<8x32xf32>
    %143 = math.tanh %142 : vector<8x32xf32>
    %144 = arith.mulf %139, %143 : vector<8x32xf32>
    %cst_39 = arith.constant dense<0.000000e+00> : vector<8x16xf32>
    %145 = tpu.matmul %144, %6, %cst_39 {dimension_numbers = #tpu.dot_dimension_numbers<[1], [0], [0], [1], [0, 0, 1, 1], [], []>} : vector<8x32xf32>, vector<32x16xf32>, vector<8x16xf32> -> vector<8x16xf32>
    %146 = arith.addf %145, %7 : vector<8x16xf32>
    %c0_40 = arith.constant 0 : index
    %c96 = arith.constant 96 : index
    %147 = vector.load %arg3[%c0_40, %c96] : memref<8x128xf32, #tpu.memory_space<vmem>>, vector<8x16xf32>
    tpu.vector_store %arg3[%c0_40, %c96], %146 {strides = array<i32>} : memref<8x128xf32, #tpu.memory_space<vmem>>, vector<8x16xf32>,
    %cst_41 = arith.constant dense<0.000000e+00> : vector<8x128xf32>
    %148 = tpu.matmul %144, %3, %cst_41 {dimension_numbers = #tpu.dot_dimension_numbers<[1], [0], [0], [1], [0, 0, 1, 1], [], []>} : vector<8x32xf32>, vector<32x128xf32>, vector<8x128xf32> -> vector<8x128xf32>
    %149 = arith.addf %148, %5 : vector<8x128xf32>
    %150 = arith.negf %149 : vector<8x128xf32>
    %151 = math.exp %150 : vector<8x128xf32>
    %cst_42 = arith.constant 1.000000e+00 : f32
    %152 = vector.broadcast %cst_42 : f32 to vector<8x128xf32>
    %153 = arith.addf %152, %151 : vector<8x128xf32>
    %154 = arith.divf %152, %153 : vector<8x128xf32>
    %155 = math.tanh %149 : vector<8x128xf32>
    %156 = vector.extract_strided_slice %154 {offsets = [0, 0], sizes = [8, 32], strides = [1, 1]} : vector<8x128xf32> to vector<8x32xf32>
    %157 = vector.extract_strided_slice %154 {offsets = [0, 32], sizes = [8, 32], strides = [1, 1]} : vector<8x128xf32> to vector<8x32xf32>
    %158 = vector.extract_strided_slice %155 {offsets = [0, 64], sizes = [8, 32], strides = [1, 1]} : vector<8x128xf32> to vector<8x32xf32>
    %159 = vector.extract_strided_slice %154 {offsets = [0, 96], sizes = [8, 32], strides = [1, 1]} : vector<8x128xf32> to vector<8x32xf32>
    %160 = arith.mulf %157, %142 : vector<8x32xf32>
    %161 = arith.mulf %156, %158 : vector<8x32xf32>
    %162 = arith.addf %160, %161 : vector<8x32xf32>
    %163 = math.tanh %162 : vector<8x32xf32>
    %164 = arith.mulf %159, %163 : vector<8x32xf32>
    %cst_43 = arith.constant dense<0.000000e+00> : vector<8x16xf32>
    %165 = tpu.matmul %164, %6, %cst_43 {dimension_numbers = #tpu.dot_dimension_numbers<[1], [0], [0], [1], [0, 0, 1, 1], [], []>} : vector<8x32xf32>, vector<32x16xf32>, vector<8x16xf32> -> vector<8x16xf32>
    %166 = arith.addf %165, %7 : vector<8x16xf32>
    %c0_44 = arith.constant 0 : index
    %c112 = arith.constant 112 : index
    %167 = vector.load %arg3[%c0_44, %c112] : memref<8x128xf32, #tpu.memory_space<vmem>>, vector<8x16xf32>
    tpu.vector_store %arg3[%c0_44, %c112], %166 {strides = array<i32>} : memref<8x128xf32, #tpu.memory_space<vmem>>, vector<8x16xf32>,
    return
  }
}

</mosaic_0001>

<bundles_post_ra>
// kernel: tpu_custom_call.1
= control target key start
LH: loop header
LB: loop body
LE: loop exit
PB: predicated region body
PF: predicated region fallthrough
CT: control target
= control target key end

     0   :  { %8 = vsyncpa [#allocation3], 0  ;;  %s2230_s0 = inlined_call_operand.vmem [shape: f32[16,32], index: 0, kind: input, shape index: {}]   ;;  %s2231_s1 = inlined_call_operand.hbm [shape: f32[80,128], index: 1, kind: input, shape index: {}]   ;;  %s2232_s2 = inlined_call_operand.vmem [shape: f32[40,16], index: 2, kind: input, shape index: {}]   ;;  %s2233_s3 = inlined_call_operand.hbm [shape: f32[8,128], index: 3, kind: output, shape index: {}]  }
   0x1   :  { %9 = vsyncpa [#allocation4], 0  ;;  %s1967_s12 = smov [#allocation2]   ;;  %s1919_s16 = scalar_lea.hbm %s2231_s1, 1280 }
   0x2   :  { %s17_s13 = sshll.u32 %s1967_s12, 4  ;;  %p1920_p0 = scmp.ne.s32.totalorder %s2231_s1, %s1919_s16  ;;  %s18_s13 = int_to_ptr.vmem [resolvable:$true] %s17_s13 }
   0x3   :  { %p1923_p1 = scmp.lt.u32.totalorder %s1919_s16, %s2231_s1 }
   0x5   :  { %p1925_p2 = pnand %p1923_p1, %p1920_p0 }
   0x7   :  { %1928 = shalt.err (!%p1925_p2)
}
   0x8   :  { %s1929_s21 = scalar_lea.vmem %s18_s13, 1280  ;;  %p1934_p4 = scmp.lt.s32.totalorder %s18_s13, %s18_s13 }
   0x9   :  { %p1930_p3 = scmp.ne.s32.totalorder %s18_s13, %s1929_s21  ;;  %p1935_p5 = scmp.lt.s32.totalorder %s1929_s21, %s1929_s21 }
   0xb   :  { %p1936_p6 = por %p1935_p5, %p1934_p4 }
   0xd   :  { %p1937_p7 = pnand %p1936_p6, %p1930_p3 }
   0xf   :  { %1940 = shalt.err (!%p1937_p7)
}
  0x10   :  { %s1968_s22 = smov 128   ;;  %s1969_s23 = smov 8  }
  0x11   :  { %23 = dma.hbm_to_vmem [thread:$0]  %s2231_s1, 1280, %s18_s13, [#allocation3], %s1968_s22, %s1968_s22, %s1969_s23  }
  0x12   :  { %1963 = dma.done.wait [#allocation3], 1280  }
  0x13   :  { %1964 = vsyncadd [#allocation3], 4294966016  ;;  %v1970_v0 = vmov 0.0|0.0   ;;  %vm1971_vm0 = vmmov 0   ;;  %v1972_v1 = vmov 0.0   ;;  %v31_v2 = vld [vmem:[#allocation2] sm:$0xff] }
  0x14   :  { %1745 = vmatprep.subr.bf16.mxu0 %v1970_v0  ;;  %1577 = vmatprep.mubr.msk.f32.mxu0 %vm1971_vm0, %v1972_v1  ;;  %v32_v3 = vld [vmem:[#allocation2 + $0x8] sm:$0xff]  ;;  %v33_v4 = vld [vmem:[#allocation2 + $0x10] sm:$0xff]  ;;  %v34_v6 = vld [vmem:[#allocation2 + $0x18] sm:$0xff]  ;;  %vm46_vm1 = vcmask 261120   ;;  %s1973_s27 = smov 64   ;;  %s1974_s30 = smov 32  }
  0x15   :  { %1751 = vmatprep.subr.bf16.mxu1 %v1970_v0  ;;  %1588 = vmatprep.mubr.msk.f32.mxu1 %vm1971_vm0, %v1972_v1  ;;  %v1746_v5 = vpack.c.bf16 %v32_v3, %v31_v2  ;;  %v1749_v7 = vpack.c.bf16 %v34_v6, %v33_v4  ;;  %v29_v8 = vld [vmem:[%s2230_s0] sm:$0xff]  ;;  %v30_v14 = vld [vmem:[%s2230_s0 + $0x8] sm:$0xff]  ;;  %v43_v30 = vld [vmem:[%s2232_s2 + $0x10] sm:$0xff]  ;;  %vm223_vm2 = vcmask 130048   ;;  %s1976_s13 = smov 48   ;;  %s1977_s14 = smov 80  }
  0x16   :  { %v39_v9 = vld [vmem:[#allocation2 + $0x40] sm:$0xff]  ;;  %v42_v26 = vld [vmem:[%s2232_s2 + $0x8] sm:$0xff]  ;;  %v44_v31 = vld [vmem:[%s2232_s2 + $0x18] sm:$0xff]  ;;  %vm398_vm3 = vcmask 261248   ;;  %s1978_s15 = smov 96   ;;  %vm573_vm4 = vcmask 392448  }
  0x17   :  { %1747 = vmatpush3.bf16.msra.mxu0 %v1746_v5  ;;  %v41_v25 = vld [vmem:[%s2232_s2] sm:$0xff]  ;;  %v36_v29 = vld [vmem:[#allocation2 + $0x28] sm:$0xff]  ;;  %v37_v33 = vld [vmem:[#allocation2 + $0x30] sm:$0xff]  ;;  %v2050_v35 = vpack.c.bf16 %v44_v31, %v43_v30  ;;  %vm748_vm5 = vcmask 523648   ;;  %vm923_vm6 = vcmask 654848   ;;  %vm1098_vm7 = vcmask 786048  }
  0x18   :  { %1748 = vmatprep.subr.bf16.mxu0 %v1970_v0  ;;  %v35_v27 = vld [vmem:[#allocation2 + $0x20] sm:$0xff]  ;;  %v2039_v28 = vpack.c.bf16 %v42_v26, %v41_v25  ;;  %v38_v34 = vld [vmem:[#allocation2 + $0x38] sm:$0xff]  ;;  %v2082_v42 = vld [vmem:[#allocation2 + $0x48] sm:$0xff]  ;;  %vm1273_vm8 = vcmask 917248   ;;  %s1979_s16 = smov 112   ;;  %s1980_s17 = smov [#allocation5]  }
  0x19   :  { %v2047_v32 = vpack.c.bf16 %v36_v29, %v35_v27  ;;  %v2054_v36 = vpack.c.bf16 %v38_v34, %v37_v33  ;;  %v2080_v41 = vld [vmem:[%s2232_s2 + $0x20] sm:$0xff]  ;;  %s1975_s2 = smov 16   ;;  %s1456_s18 = sshll.u32 %s1980_s17, 4  ;;  %vm1448_vm9 = vcmask 1048448   ;;  %s1457_s18 = int_to_ptr.vmem [resolvable:$true] %s1456_s18 }
  0x1a   :  { %1753 = vmatpush3.bf16.msra.mxu1 %v2039_v28  ;;  %s1941_s19 = scalar_lea.vmem %s1457_s18, 128  ;;  %p1946_p9 = scmp.lt.s32.totalorder %s1457_s18, %s1457_s18 }
  0x1b   :  { %1750 = vmatpush3.bf16.msra.mxu0 %v1749_v7  ;;  %1754 = vmatprep.subr.bf16.mxu1 %v1970_v0  ;;  %p1942_p8 = scmp.ne.s32.totalorder %s1457_s18, %s1941_s19  ;;  %p1947_p10 = scmp.lt.s32.totalorder %s1941_s19, %s1941_s19 }
  0x1c   :  { %1757 = vmatprep.subr.bf16.mxu0 %v1970_v0 }
  0x1d   :  { %p1948_p11 = por %p1947_p10, %p1946_p9 }
  0x1e   :  { %1578 = vmatmul.mubr.msk.f32.vlgmr.msra.gmra.mrb[0].mxu0 %vm46_vm1, %v29_v8  ;;  %1756 = vmatpush3.bf16.msra.mxu1 %v2050_v35 }
  0x1f   :  { %1599 = vmatprep.mubr.msk.f32.mxu0 %vm1971_vm0, %v1972_v1  ;;  %1759 = vmatpush3.bf16.msra.mxu0 %v2047_v32  ;;  %p1949_p12 = pnand %p1948_p11, %p1942_p8 }
  0x20   :  { %1760 = vmatprep.subr.bf16.mxu0 %v1970_v0  ;;  %1763 = vmatprep.subr.bf16.mxu1 %v1970_v0 }
  0x23   :  { %1762 = vmatpush3.bf16.msra.mxu0 %v2054_v36 }
  0x24   :  { %1769 = vmatprep.subr.bf16.mxu0 %v1970_v0 }
  0xf1   :  { %v116_v10 = vpop.f32.mrb[0].mxu0 }
  0xf2   :  { %v117_v11 = vadd.f32 %v116_v10, %v39_v9  ;;  %v1579_v12 = vpop.f32.mrb[1].mxu0 }
  0xf4   :  { %1855 = vtanh.f32 %v117_v11  ;;  %v1466_v15 = vmul.f32 -1.442695, %v117_v11 }
  0xf6   :  { %1857 = vpow2.f32 %v1466_v15 }
  0xfe   :  { %v1856_v13 = vpop.eup %1855 }
  0xff   :  { %133 = vrot.lane.b32.xlu0 %v1856_v13, %s1973_s27 }
 0x100   :  { %v1858_v16 = vpop.eup %1857 }
 0x101   :  { %v123_v17 = vadd.f32 1.0, %v1858_v16 }
 0x103   :  { %128 = vrot.lane.b32.xlu0 %v30_v14, %s1974_s30  ;;  %1859 = vrcp.f32 %v123_v17 }
 0x10d   :  { %v1860_v18 = vpop.eup %1859 }
 0x171   :  { %v134_v19 = vpop.permute.xlu0 %133 }
 0x172   :  { %v136_v20 = vmul.f32 %v1860_v18, %v134_v19 }
 0x174   :  { %138 = vrot.lane.b32.xlu1 %v136_v20, %s1974_s30 }
 0x175   :  { %v129_v21 = vpop.permute.xlu0 %128 }
 0x176   :  { %v131_v22 = vmul.f32 %v1860_v18, %v129_v21 }
 0x1e6   :  { %v139_v23 = vpop.permute.xlu1 %138 }
 0x1e7   :  { %v141_v24 = vadd.f32 %v139_v23, %v131_v22 }
 0x1e9   :  { %1861 = vtanh.f32 %v141_v24 }
 0x1f3   :  { %v1862_v37 = vpop.eup %1861 }
 0x1f4   :  { %144 = vrot.lane.b32.xlu1 %v1862_v37, %s1973_s27 }
 0x266   :  { %v145_v38 = vpop.permute.xlu1 %144 }
 0x267   :  { %v147_v39 = vmul.f32 %v1860_v18, %v145_v38 }
 0x269   :  { %149 = vrot.lane.b32.xlu0 %v147_v39, %s1974_s30 }
 0x2db   :  { %v150_v40 = vpop.permute.xlu0 %149 }
 0x2dc   :  { %1589 = vmatmul.mubr.msk.f32.vlgmr.msra.gmra.mrb[0].mxu1 %vm46_vm1, %v150_v40  ;;  %1600 = vmatmul.mubr.msk.f32.vlgmr.msra.gmra.mrb[2].mxu0 %vm46_vm1, %v150_v40 }
 0x2dd   :  { %1765 = vmatpush3.bf16.msra.mxu1 %v2039_v28  ;;  %1771 = vmatpush3.bf16.msra.mxu0 %v2047_v32 }
 0x2de   :  { %1766 = vmatprep.subr.bf16.mxu1 %v1970_v0  ;;  %1772 = vmatprep.subr.bf16.mxu0 %v1970_v0 }
 0x2df   :  { %1610 = vmatprep.mubr.msk.f32.mxu1 %vm1971_vm0, %v1972_v1  ;;  %1621 = vmatprep.mubr.msk.f32.mxu0 %vm1971_vm0, %v1972_v1 }
 0x2e1   :  { %1768 = vmatpush3.bf16.msra.mxu1 %v2050_v35  ;;  %1774 = vmatpush3.bf16.msra.mxu0 %v2054_v36 }
 0x2e2   :  { %1775 = vmatprep.subr.bf16.mxu1 %v1970_v0  ;;  %1781 = vmatprep.subr.bf16.mxu0 %v1970_v0 }
 0x3af   :  { %v219_v43 = vpop.f32.mrb[0].mxu1  ;;  %v291_v44 = vpop.f32.mrb[2].mxu0 }
 0x3b0   :  { %v220_v45 = vadd.f32 %v219_v43, %v2080_v41  ;;  %v292_v46 = vadd.f32 %v291_v44, %v2082_v42  ;;  %v1590_v47 = vpop.f32.mrb[1].mxu1  ;;  %v1601_v48 = vpop.f32.mrb[3].mxu0 }
 0x3b2   :  { %224 = vst.msk [vmem:[#allocation5] sm:$0xff] %vm223_vm2, %v220_v45  ;;  %1863 = vtanh.f32 %v292_v46  ;;  %v1469_v50 = vmul.f32 -1.442695, %v292_v46 }
 0x3b4   :  { %1865 = vpow2.f32 %v1469_v50 }
 0x3bc   :  { %v1864_v49 = vpop.eup %1863 }
 0x3bd   :  { %304 = vrot.lane.b32.xlu1 %v1864_v49, %s1973_s27 }
 0x3be   :  { %v1866_v51 = vpop.eup %1865 }
 0x3bf   :  { %v298_v52 = vadd.f32 1.0, %v1866_v51 }
 0x3c1   :  { %1867 = vrcp.f32 %v298_v52 }
 0x3cb   :  { %v1868_v53 = vpop.eup %1867 }
 0x3cc   :  { %v302_v56 = vmul.f32 %v1868_v53, %v141_v24 }
 0x42f   :  { %v305_v54 = vpop.permute.xlu1 %304 }
 0x430   :  { %v307_v55 = vmul.f32 %v1868_v53, %v305_v54 }
 0x432   :  { %309 = vrot.lane.b32.xlu0 %v307_v55, %s1974_s30 }
 0x4a4   :  { %v310_v57 = vpop.permute.xlu0 %309 }
 0x4a5   :  { %v312_v58 = vadd.f32 %v310_v57, %v302_v56 }
 0x4a7   :  { %1869 = vtanh.f32 %v312_v58 }
 0x4b1   :  { %v1870_v59 = vpop.eup %1869 }
 0x4b2   :  { %315 = vrot.lane.b32.xlu1 %v1870_v59, %s1973_s27 }
 0x524   :  { %v316_v60 = vpop.permute.xlu1 %315 }
 0x525   :  { %v318_v61 = vmul.f32 %v1868_v53, %v316_v60 }
 0x527   :  { %320 = vrot.lane.b32.xlu0 %v318_v61, %s1974_s30 }
 0x599   :  { %v321_v62 = vpop.permute.xlu0 %320 }
 0x59a   :  { %1611 = vmatmul.mubr.msk.f32.vlgmr.msra.gmra.mrb[2].mxu1 %vm46_vm1, %v321_v62  ;;  %1622 = vmatmul.mubr.msk.f32.vlgmr.msra.gmra.mrb[4].mxu0 %vm46_vm1, %v321_v62 }
 0x59b   :  { %1777 = vmatpush3.bf16.msra.mxu1 %v2039_v28  ;;  %1783 = vmatpush3.bf16.msra.mxu0 %v2047_v32 }
 0x59c   :  { %1778 = vmatprep.subr.bf16.mxu1 %v1970_v0  ;;  %1784 = vmatprep.subr.bf16.mxu0 %v1970_v0 }
 0x59d   :  { %1632 = vmatprep.mubr.msk.f32.mxu1 %vm1971_vm0, %v1972_v1  ;;  %1643 = vmatprep.mubr.msk.f32.mxu0 %vm1971_vm0, %v1972_v1 }
 0x59f   :  { %1780 = vmatpush3.bf16.msra.mxu1 %v2050_v35  ;;  %1786 = vmatpush3.bf16.msra.mxu0 %v2054_v36 }
 0x5a0   :  { %1787 = vmatprep.subr.bf16.mxu1 %v1970_v0  ;;  %1793 = vmatprep.subr.bf16.mxu0 %v1970_v0 }
 0x66d   :  { %v2104_v63 = vpop.f32.mrb[2].mxu1  ;;  %v466_v2 = vpop.f32.mrb[4].mxu0 }
 0x66e   :  { %v467_v3 = vadd.f32 %v466_v2, %v2082_v42  ;;  %v1612_v4 = vpop.f32.mrb[3].mxu1  ;;  %v1623_v5 = vpop.f32.mrb[5].mxu0 }
 0x670   :  { %1871 = vtanh.f32 %v467_v3  ;;  %v1472_v7 = vmul.f32 -1.442695, %v467_v3 }
 0x672   :  { %1873 = vpow2.f32 %v1472_v7 }
 0x67a   :  { %v1872_v6 = vpop.eup %1871 }
 0x67b   :  { %479 = vrot.lane.b32.xlu1 %v1872_v6, %s1973_s27 }
 0x67c   :  { %v1874_v8 = vpop.eup %1873 }
 0x67d   :  { %v473_v9 = vadd.f32 1.0, %v1874_v8 }
 0x67f   :  { %1875 = vrcp.f32 %v473_v9 }
 0x689   :  { %v1876_v10 = vpop.eup %1875 }
 0x68a   :  { %v477_v13 = vmul.f32 %v1876_v10, %v312_v58 }
 0x6ed   :  { %v480_v11 = vpop.permute.xlu1 %479 }
 0x6ee   :  { %v482_v12 = vmul.f32 %v1876_v10, %v480_v11 }
 0x6f0   :  { %484 = vrot.lane.b32.xlu0 %v482_v12, %s1974_s30 }
 0x762   :  { %v485_v14 = vpop.permute.xlu0 %484 }
 0x763   :  { %v487_v15 = vadd.f32 %v485_v14, %v477_v13 }
 0x765   :  { %1877 = vtanh.f32 %v487_v15 }
 0x76f   :  { %v1878_v16 = vpop.eup %1877 }
 0x770   :  { %490 = vrot.lane.b32.xlu1 %v1878_v16, %s1973_s27 }
 0x7e2   :  { %v491_v17 = vpop.permute.xlu1 %490 }
 0x7e3   :  { %v493_v18 = vmul.f32 %v1876_v10, %v491_v17 }
 0x7e5   :  { %495 = vrot.lane.b32.xlu0 %v493_v18, %s1974_s30 }
 0x857   :  { %v496_v19 = vpop.permute.xlu0 %495 }
 0x858   :  { %1633 = vmatmul.mubr.msk.f32.vlgmr.msra.gmra.mrb[4].mxu1 %vm46_vm1, %v496_v19  ;;  %1644 = vmatmul.mubr.msk.f32.vlgmr.msra.gmra.mrb[6].mxu0 %vm46_vm1, %v496_v19 }
 0x859   :  { %1789 = vmatpush3.bf16.msra.mxu1 %v2039_v28  ;;  %1795 = vmatpush3.bf16.msra.mxu0 %v2047_v32 }
 0x85a   :  { %1790 = vmatprep.subr.bf16.mxu1 %v1970_v0  ;;  %1796 = vmatprep.subr.bf16.mxu0 %v1970_v0 }
 0x85b   :  { %1654 = vmatprep.mubr.msk.f32.mxu1 %vm1971_vm0, %v1972_v1  ;;  %1665 = vmatprep.mubr.msk.f32.mxu0 %vm1971_vm0, %v1972_v1 }
 0x85d   :  { %1792 = vmatpush3.bf16.msra.mxu1 %v2050_v35  ;;  %1798 = vmatpush3.bf16.msra.mxu0 %v2054_v36 }
 0x85e   :  { %1799 = vmatprep.subr.bf16.mxu1 %v1970_v0  ;;  %1805 = vmatprep.subr.bf16.mxu0 %v1970_v0 }
 0x92b   :  { %v2125_v20 = vpop.f32.mrb[4].mxu1  ;;  %v641_v21 = vpop.f32.mrb[6].mxu0 }
 0x92c   :  { %v642_v22 = vadd.f32 %v641_v21, %v2082_v42  ;;  %v1634_v23 = vpop.f32.mrb[5].mxu1  ;;  %v1645_v24 = vpop.f32.mrb[7].mxu0 }
 0x92e   :  { %1879 = vtanh.f32 %v642_v22  ;;  %v1475_v26 = vmul.f32 -1.442695, %v642_v22 }
 0x930   :  { %1881 = vpow2.f32 %v1475_v26 }
 0x938   :  { %v1880_v25 = vpop.eup %1879 }
 0x939   :  { %654 = vrot.lane.b32.xlu1 %v1880_v25, %s1973_s27 }
 0x93a   :  { %v1882_v27 = vpop.eup %1881 }
 0x93b   :  { %v648_v29 = vadd.f32 1.0, %v1882_v27 }
 0x93d   :  { %1883 = vrcp.f32 %v648_v29 }
 0x947   :  { %v1884_v30 = vpop.eup %1883 }
 0x948   :  { %v652_v34 = vmul.f32 %v1884_v30, %v487_v15 }
 0x9ab   :  { %v655_v31 = vpop.permute.xlu1 %654 }
 0x9ac   :  { %v657_v33 = vmul.f32 %v1884_v30, %v655_v31 }
 0x9ae   :  { %659 = vrot.lane.b32.xlu0 %v657_v33, %s1974_s30 }
 0xa20   :  { %v660_v37 = vpop.permute.xlu0 %659 }
 0xa21   :  { %v662_v38 = vadd.f32 %v660_v37, %v652_v34 }
 0xa23   :  { %1885 = vtanh.f32 %v662_v38 }
 0xa2d   :  { %v1886_v39 = vpop.eup %1885 }
 0xa2e   :  { %665 = vrot.lane.b32.xlu1 %v1886_v39, %s1973_s27 }
 0xaa0   :  { %v666_v40 = vpop.permute.xlu1 %665 }
 0xaa1   :  { %v668_v43 = vmul.f32 %v1884_v30, %v666_v40 }
 0xaa3   :  { %670 = vrot.lane.b32.xlu0 %v668_v43, %s1974_s30 }
 0xb15   :  { %v671_v44 = vpop.permute.xlu0 %670 }
 0xb16   :  { %1655 = vmatmul.mubr.msk.f32.vlgmr.msra.gmra.mrb[6].mxu1 %vm46_vm1, %v671_v44  ;;  %1666 = vmatmul.mubr.msk.f32.vlgmr.msra.gmra.mrb[8].mxu0 %vm46_vm1, %v671_v44 }
 0xb17   :  { %1801 = vmatpush3.bf16.msra.mxu1 %v2039_v28  ;;  %1807 = vmatpush3.bf16.msra.mxu0 %v2047_v32 }
 0xb18   :  { %1802 = vmatprep.subr.bf16.mxu1 %v1970_v0  ;;  %1808 = vmatprep.subr.bf16.mxu0 %v1970_v0 }
 0xb19   :  { %1676 = vmatprep.mubr.msk.f32.mxu1 %vm1971_vm0, %v1972_v1  ;;  %1687 = vmatprep.mubr.msk.f32.mxu0 %vm1971_vm0, %v1972_v1 }
 0xb1b   :  { %1804 = vmatpush3.bf16.msra.mxu1 %v2050_v35  ;;  %1810 = vmatpush3.bf16.msra.mxu0 %v2054_v36 }
 0xb1c   :  { %1811 = vmatprep.subr.bf16.mxu1 %v1970_v0  ;;  %1817 = vmatprep.subr.bf16.mxu0 %v1970_v0 }
 0xbe9   :  { %v2146_v45 = vpop.f32.mrb[6].mxu1  ;;  %v816_v46 = vpop.f32.mrb[8].mxu0 }
 0xbea   :  { %v817_v47 = vadd.f32 %v816_v46, %v2082_v42  ;;  %v1656_v48 = vpop.f32.mrb[7].mxu1  ;;  %v1667_v49 = vpop.f32.mrb[9].mxu0 }
 0xbec   :  { %1887 = vtanh.f32 %v817_v47  ;;  %v1478_v51 = vmul.f32 -1.442695, %v817_v47 }
 0xbee   :  { %1889 = vpow2.f32 %v1478_v51 }
 0xbf6   :  { %v1888_v50 = vpop.eup %1887 }
 0xbf7   :  { %829 = vrot.lane.b32.xlu1 %v1888_v50, %s1973_s27 }
 0xbf8   :  { %v1890_v52 = vpop.eup %1889 }
 0xbf9   :  { %v823_v53 = vadd.f32 1.0, %v1890_v52 }
 0xbfb   :  { %1891 = vrcp.f32 %v823_v53 }
 0xc05   :  { %v1892_v54 = vpop.eup %1891 }
 0xc06   :  { %v827_v57 = vmul.f32 %v1892_v54, %v662_v38 }
 0xc69   :  { %v830_v55 = vpop.permute.xlu1 %829 }
 0xc6a   :  { %v832_v56 = vmul.f32 %v1892_v54, %v830_v55 }
 0xc6c   :  { %834 = vrot.lane.b32.xlu0 %v832_v56, %s1974_s30 }
 0xcde   :  { %v835_v58 = vpop.permute.xlu0 %834 }
 0xcdf   :  { %v837_v59 = vadd.f32 %v835_v58, %v827_v57  ;;  %v391_v58 = vadd.f32 %v2104_v63, %v2080_v41  ;;  %v566_v63 = vadd.f32 %v2125_v20, %v2080_v41 }
 0xce1   :  { %1893 = vtanh.f32 %v837_v59 }
 0xceb   :  { %v1894_v60 = vpop.eup %1893 }
 0xcec   :  { %840 = vrot.lane.b32.xlu1 %v1894_v60, %s1973_s27 }
 0xd5e   :  { %v841_v61 = vpop.permute.xlu1 %840 }
 0xd5f   :  { %v843_v62 = vmul.f32 %v1892_v54, %v841_v61 }
 0xd61   :  { %845 = vrot.lane.b32.xlu0 %v843_v62, %s1974_s30 }
 0xdd3   :  { %v846_v2 = vpop.permute.xlu0 %845 }
 0xdd4   :  { %1677 = vmatmul.mubr.msk.f32.vlgmr.msra.gmra.mrb[8].mxu1 %vm46_vm1, %v846_v2  ;;  %1688 = vmatmul.mubr.msk.f32.vlgmr.msra.gmra.mrb[10].mxu0 %vm46_vm1, %v846_v2 }
 0xdd5   :  { %1813 = vmatpush3.bf16.msra.mxu1 %v2039_v28  ;;  %1819 = vmatpush3.bf16.msra.mxu0 %v2047_v32 }
 0xdd6   :  { %1814 = vmatprep.subr.bf16.mxu1 %v1970_v0  ;;  %1820 = vmatprep.subr.bf16.mxu0 %v1970_v0 }
 0xdd7   :  { %1698 = vmatprep.mubr.msk.f32.mxu1 %vm1971_vm0, %v1972_v1  ;;  %1709 = vmatprep.mubr.msk.f32.mxu0 %vm1971_vm0, %v1972_v1 }
 0xdd9   :  { %1816 = vmatpush3.bf16.msra.mxu1 %v2050_v35  ;;  %1822 = vmatpush3.bf16.msra.mxu0 %v2054_v36 }
 0xdda   :  { %1823 = vmatprep.subr.bf16.mxu1 %v1970_v0  ;;  %1829 = vmatprep.subr.bf16.mxu0 %v1970_v0 }
 0xea7   :  { %v2167_v3 = vpop.f32.mrb[8].mxu1  ;;  %v991_v4 = vpop.f32.mrb[10].mxu0 }
 0xea8   :  { %v992_v5 = vadd.f32 %v991_v4, %v2082_v42  ;;  %v1678_v6 = vpop.f32.mrb[9].mxu1  ;;  %v1689_v7 = vpop.f32.mrb[11].mxu0 }
 0xeaa   :  { %1895 = vtanh.f32 %v992_v5  ;;  %v1481_v9 = vmul.f32 -1.442695, %v992_v5 }
 0xeac   :  { %1897 = vpow2.f32 %v1481_v9 }
 0xeb4   :  { %v1896_v8 = vpop.eup %1895 }
 0xeb5   :  { %1004 = vrot.lane.b32.xlu1 %v1896_v8, %s1973_s27 }
 0xeb6   :  { %v1898_v10 = vpop.eup %1897 }
 0xeb7   :  { %v998_v11 = vadd.f32 1.0, %v1898_v10 }
 0xeb9   :  { %1899 = vrcp.f32 %v998_v11 }
 0xec3   :  { %v1900_v12 = vpop.eup %1899 }
 0xec4   :  { %v1002_v15 = vmul.f32 %v1900_v12, %v837_v59  ;;  %v741_v59 = vadd.f32 %v2146_v45, %v2080_v41  ;;  %v916_v45 = vadd.f32 %v2167_v3, %v2080_v41 }
 0xf27   :  { %v1005_v13 = vpop.permute.xlu1 %1004 }
 0xf28   :  { %v1007_v14 = vmul.f32 %v1900_v12, %v1005_v13 }
 0xf2a   :  { %1009 = vrot.lane.b32.xlu0 %v1007_v14, %s1974_s30 }
 0xf9c   :  { %v1010_v16 = vpop.permute.xlu0 %1009 }
 0xf9d   :  { %v1012_v17 = vadd.f32 %v1010_v16, %v1002_v15 }
 0xf9f   :  { %1901 = vtanh.f32 %v1012_v17 }
 0xfa9   :  { %v1902_v18 = vpop.eup %1901 }
 0xfaa   :  { %1015 = vrot.lane.b32.xlu1 %v1902_v18, %s1973_s27 }
0x101c   :  { %v1016_v19 = vpop.permute.xlu1 %1015 }
0x101d   :  { %v1018_v21 = vmul.f32 %v1900_v12, %v1016_v19 }
0x101f   :  { %1020 = vrot.lane.b32.xlu0 %v1018_v21, %s1974_s30 }
0x1091   :  { %v1021_v22 = vpop.permute.xlu0 %1020 }
0x1092   :  { %1699 = vmatmul.mubr.msk.f32.vlgmr.msra.gmra.mrb[10].mxu1 %vm46_vm1, %v1021_v22  ;;  %1710 = vmatmul.mubr.msk.f32.vlgmr.msra.gmra.mrb[12].mxu0 %vm46_vm1, %v1021_v22 }
0x1093   :  { %1825 = vmatpush3.bf16.msra.mxu1 %v2039_v28  ;;  %1831 = vmatpush3.bf16.msra.mxu0 %v2047_v32 }
0x1094   :  { %1826 = vmatprep.subr.bf16.mxu1 %v1970_v0  ;;  %1832 = vmatprep.subr.bf16.mxu0 %v1970_v0 }
0x1095   :  { %1720 = vmatprep.mubr.msk.f32.mxu1 %vm1971_vm0, %v1972_v1  ;;  %1731 = vmatprep.mubr.msk.f32.mxu0 %vm1971_vm0, %v1972_v1 }
0x1097   :  { %1828 = vmatpush3.bf16.msra.mxu1 %v2050_v35  ;;  %1834 = vmatpush3.bf16.msra.mxu0 %v2054_v36 }
0x1098   :  { %1835 = vmatprep.subr.bf16.mxu1 %v1970_v0 }
0x1165   :  { %v1090_v23 = vpop.f32.mrb[10].mxu1  ;;  %v1166_v24 = vpop.f32.mrb[12].mxu0 }
0x1166   :  { %v1167_v32 = vadd.f32 %v1166_v24, %v2082_v42  ;;  %v1700_v25 = vpop.f32.mrb[11].mxu1  ;;  %v1711_v26 = vpop.f32.mrb[13].mxu0  ;;  %v1091_v60 = vadd.f32 %v1090_v23, %v2080_v41 }
0x1168   :  { %1903 = vtanh.f32 %v1167_v32  ;;  %v1484_v29 = vmul.f32 -1.442695, %v1167_v32 }
0x116a   :  { %1905 = vpow2.f32 %v1484_v29 }
0x1172   :  { %v1904_v27 = vpop.eup %1903 }
0x1173   :  { %1179 = vrot.lane.b32.xlu1 %v1904_v27, %s1973_s27 }
0x1174   :  { %v1906_v30 = vpop.eup %1905 }
0x1175   :  { %v1173_v31 = vadd.f32 1.0, %v1906_v30 }
0x1177   :  { %1907 = vrcp.f32 %v1173_v31 }
0x1181   :  { %v1908_v33 = vpop.eup %1907 }
0x1182   :  { %v1177_v37 = vmul.f32 %v1908_v33, %v1012_v17 }
0x11e5   :  { %v1180_v34 = vpop.permute.xlu1 %1179 }
0x11e6   :  { %v1182_v36 = vmul.f32 %v1908_v33, %v1180_v34 }
0x11e8   :  { %1184 = vrot.lane.b32.xlu0 %v1182_v36, %s1974_s30 }
0x125a   :  { %v1185_v38 = vpop.permute.xlu0 %1184 }
0x125b   :  { %v1187_v39 = vadd.f32 %v1185_v38, %v1177_v37 }
0x125d   :  { %1909 = vtanh.f32 %v1187_v39 }
0x1267   :  { %v1910_v40 = vpop.eup %1909 }
0x1268   :  { %1190 = vrot.lane.b32.xlu1 %v1910_v40, %s1973_s27 }
0x12da   :  { %v1191_v43 = vpop.permute.xlu1 %1190 }
0x12db   :  { %v1193_v44 = vmul.f32 %v1908_v33, %v1191_v43 }
0x12dd   :  { %1195 = vrot.lane.b32.xlu0 %v1193_v44, %s1974_s30 }
0x134f   :  { %v1196_v46 = vpop.permute.xlu0 %1195 }
0x1350   :  { %1721 = vmatmul.mubr.msk.f32.vlgmr.msra.gmra.mrb[12].mxu1 %vm46_vm1, %v1196_v46  ;;  %1732 = vmatmul.mubr.msk.f32.vlgmr.msra.gmra.mrb[14].mxu0 %vm46_vm1, %v1196_v46 }
0x1351   :  { %1837 = vmatpush3.bf16.msra.mxu1 %v2039_v28  ;;  %1742 = vmatprep.mubr.msk.f32.mxu1 %vm1971_vm0, %v1972_v1 }
0x1352   :  { %1838 = vmatprep.subr.bf16.mxu1 %v1970_v0 }
0x1355   :  { %1840 = vmatpush3.bf16.msra.mxu1 %v2050_v35 }
0x1423   :  { %v1265_v47 = vpop.f32.mrb[12].mxu1  ;;  %v1341_v48 = vpop.f32.mrb[14].mxu0 }
0x1424   :  { %v1342_v49 = vadd.f32 %v1341_v48, %v2082_v42  ;;  %v1722_v50 = vpop.f32.mrb[13].mxu1  ;;  %v1733_v51 = vpop.f32.mrb[15].mxu0  ;;  %v1266_v4 = vadd.f32 %v1265_v47, %v2080_v41 }
0x1426   :  { %1911 = vtanh.f32 %v1342_v49  ;;  %v1487_v53 = vmul.f32 -1.442695, %v1342_v49 }
0x1428   :  { %1913 = vpow2.f32 %v1487_v53 }
0x1430   :  { %v1912_v52 = vpop.eup %1911 }
0x1431   :  { %1354 = vrot.lane.b32.xlu1 %v1912_v52, %s1973_s27 }
0x1432   :  { %v1914_v28 = vpop.eup %1913 }
0x1433   :  { %v1348_v54 = vadd.f32 1.0, %v1914_v28 }
0x1435   :  { %1915 = vrcp.f32 %v1348_v54 }
0x143f   :  { %v1916_v1 = vpop.eup %1915 }
0x1440   :  { %v1352_v35 = vmul.f32 %v1916_v1, %v1187_v39 }
0x14a3   :  { %v1355_v55 = vpop.permute.xlu1 %1354 }
0x14a4   :  { %v1357_v0 = vmul.f32 %v1916_v1, %v1355_v55 }
0x14a6   :  { %1359 = vrot.lane.b32.xlu0 %v1357_v0, %s1974_s30 }
0x1518   :  { %v1360_v56 = vpop.permute.xlu0 %1359 }
0x1519   :  { %v1362_v57 = vadd.f32 %v1360_v56, %v1352_v35 }
0x151b   :  { %1917 = vtanh.f32 %v1362_v57 }
0x1525   :  { %v1918_v42 = vpop.eup %1917 }
0x1526   :  { %1365 = vrot.lane.b32.xlu1 %v1918_v42, %s1973_s27 }
0x152a   :  { %395 = vrot.lane.b32.xlu1 %v391_v58, %s1975_s2 }
0x152e   :  { %745 = vrot.lane.b32.xlu1 %v741_v59, %s1976_s13 }
0x1532   :  { %1095 = vrot.lane.b32.xlu1 %v1091_v60, %s1977_s14 }
0x1598   :  { %v1366_v61 = vpop.permute.xlu1 %1365 }
0x1599   :  { %v1368_v62 = vmul.f32 %v1916_v1, %v1366_v61 }
0x159b   :  { %1370 = vrot.lane.b32.xlu0 %v1368_v62, %s1974_s30 }
0x159c   :  { %v396_v2 = vpop.permute.xlu1 %395 }
0x159d   :  { %399 = vst.msk [vmem:[#allocation5] sm:$0xff] %vm398_vm3, %v396_v2 }
0x159f   :  { %570 = vrot.lane.b32.xlu0 %v566_v63, %s1974_s30 }
0x15a0   :  { %v746_v6 = vpop.permute.xlu1 %745 }
0x15a3   :  { %920 = vrot.lane.b32.xlu0 %v916_v45, %s1973_s27 }
0x15a4   :  { %v1096_v8 = vpop.permute.xlu1 %1095 }
0x15a7   :  { %1270 = vrot.lane.b32.xlu0 %v1266_v4, %s1978_s15 }
0x160d   :  { %v1371_v5 = vpop.permute.xlu0 %1370 }
0x160e   :  { %1743 = vmatmul.mubr.msk.f32.vlgmr.msra.gmra.mrb[14].mxu1 %vm46_vm1, %v1371_v5 }
0x1611   :  { %v571_v7 = vpop.permute.xlu0 %570 }
0x1612   :  { %574 = vst.msk [vmem:[#allocation5] sm:$0xff] %vm573_vm4, %v571_v7 }
0x1613   :  { %749 = vst.msk [vmem:[#allocation5] sm:$0xff] %vm748_vm5, %v746_v6 }
0x1615   :  { %v921_v20 = vpop.permute.xlu0 %920 }
0x1616   :  { %924 = vst.msk [vmem:[#allocation5] sm:$0xff] %vm923_vm6, %v921_v20 }
0x1617   :  { %1099 = vst.msk [vmem:[#allocation5] sm:$0xff] %vm1098_vm7, %v1096_v8 }
0x1619   :  { %v1271_v3 = vpop.permute.xlu0 %1270 }
0x161a   :  { %1274 = vst.msk [vmem:[#allocation5] sm:$0xff] %vm1273_vm8, %v1271_v3 }
0x16e1   :  { %v1440_v9 = vpop.f32.mrb[14].mxu1 }
0x16e2   :  { %v1441_v10 = vadd.f32 %v1440_v9, %v2080_v41  ;;  %v1744_v11 = vpop.f32.mrb[15].mxu1 }
0x16e4   :  { %1445 = vrot.lane.b32.xlu1 %v1441_v10, %s1979_s16 }
0x1756   :  { %v1446_v12 = vpop.permute.xlu1 %1445 }
0x1757   :  { %1449 = vst.msk [vmem:[#allocation5] sm:$0xff] %vm1448_vm9, %v1446_v12 }
0x1758   :  { %1952 = shalt.err (!%p1949_p12)
}
0x1759   :  { %s1953_s22 = scalar_lea.hbm %s2233_s3, 128 }
0x175a   :  { %p1954_p13 = scmp.ne.s32.totalorder %s2233_s3, %s1953_s22  ;;  %p1957_p0 = scmp.lt.u32.totalorder %s1953_s22, %s2233_s3 }
0x175c   :  { %p1959_p1 = pnand %p1957_p0, %p1954_p13 }
0x175e   :  { %1962 = shalt.err (!%p1959_p1)
}
0x175f   :  { %1459 = dma.vmem_to_hbm [thread:$0]  %s1457_s18, 128, %s2233_s3, [#allocation4]  }
0x1760   :  { %1965 = dma.done.wait [#allocation4], 128  }
0x1761   :  { %1966 = vsyncadd [#allocation4], 4294967168 }
0x1762   :  { %1463 = vsyncpa [#allocation3], 1 }
0x1763   :  { %1464 = vsyncpa [#allocation4], 1 }

</bundles_post_ra>
